<compile_context>
chip_gen: v5e
topology: v5e:2x2
jax: 0.10.0
libtpu: 0.0.40
codegen_flags: <defaults>
</compile_context>

<pallas_src>
import functools

import jax
import jax.numpy as jnp
from jax import lax
from jax.experimental import pallas as pl
from jax.experimental.pallas import tpu as pltpu

LN_EPS = 1e-5
_INV_SQRT2 = 0.7071067811865476
_MIB = 1024 * 1024


def _round_up(x, m):
    return ((x + m - 1) // m) * m


def _device_mxu_align():
    """256 for the 2x256x256 MXU generations (v6e/v7x), 128 for <= v5."""
    try:
        kind = jax.devices()[0].device_kind.lower()
    except Exception:
        return 256
    for tag in ("v2", "v3", "v4", "v5"):
        if tag in kind:
            return 128
    return 256


def _vmem_capacity_bytes():
    try:
        return int(pltpu.get_tpu_info().vmem_capacity_bytes)
    except Exception:
        return 64 * _MIB  # conservative: v7x per-TensorCore VMEM


def _layer_norm_f32(x, gamma, beta, dim_in):
    """LayerNorm over the last axis; padded lanes (>= dim_in) stay exactly zero
    because gamma/beta padding is zero and the centered values are masked."""
    mean = jnp.sum(x, axis=-1, keepdims=True) * (1.0 / dim_in)
    xc = x - mean
    if x.shape[-1] != dim_in:
        col = lax.broadcasted_iota(jnp.int32, x.shape, 1)
        xc = jnp.where(col < dim_in, xc, 0.0)
    var = jnp.sum(xc * xc, axis=-1, keepdims=True) * (1.0 / dim_in)
    inv = lax.rsqrt(var + LN_EPS)
    return xc * inv * gamma + beta


def _gelu_erf(h):
    # PyTorch nn.GELU() default = exact erf GELU. (Switch to the tanh approx /
    # EUP path only if a bundle dump shows VALU as the binding slot.)
    return 0.5 * h * (1.0 + lax.erf(h * _INV_SQRT2))


# --------------------------------------------------------------------------
# Path A: weights resident in VMEM (fetched once), grid = (token_tiles,).
# Hidden dim processed in static in-kernel chunks of `th` columns to bound the
# live (tm, th) f32 GELU intermediate.
# --------------------------------------------------------------------------
def _ffn_resident_kernel(x_ref, gamma_ref, beta_ref, w1_ref, b1_ref, w2_ref, b2_ref,
                         o_ref, xn_ref, acc_ref, *, dim_in, th, n_chunks):
    x = x_ref[...].astype(jnp.float32)
    xn = _layer_norm_f32(x, gamma_ref[...].astype(jnp.float32),
                         beta_ref[...].astype(jnp.float32), dim_in)
    xn_ref[...] = xn.astype(xn_ref.dtype)      # bf16 MXU operand
    b2 = b2_ref[...].astype(jnp.float32)

    for c in range(n_chunks):
        lo = c * th
        h = jnp.dot(xn_ref[...], w1_ref[:, lo:lo + th],
                    preferred_element_type=jnp.float32) \
            + b1_ref[:, lo:lo + th].astype(jnp.float32)
        g = _gelu_erf(h)
        partial = jnp.dot(g.astype(w2_ref.dtype), w2_ref[lo:lo + th, :],
                          preferred_element_type=jnp.float32)
        if n_chunks == 1:
            o_ref[...] = (partial + b2).astype(o_ref.dtype)
        elif c == 0:
            acc_ref[...] = partial              # no zero-init round-trip
        elif c < n_chunks - 1:
            acc_ref[...] += partial
        else:
            # last chunk: fold partial + bias directly into the output store
            o_ref[...] = (acc_ref[...] + partial + b2).astype(o_ref.dtype)
    # Dropout(p=0.0) / eval mode is the identity.
    # TODO(synk): add pltpu.prng_random_bits-based dropout masks if p > 0 / training.


# --------------------------------------------------------------------------
# Path B: weights streamed from HBM, grid = (token_tiles, hidden_tiles),
# hidden axis is the innermost ("arbitrary") reduction.
# --------------------------------------------------------------------------
def _ffn_stream_kernel(x_ref, gamma_ref, beta_ref, w1_ref, b1_ref, w2_ref, b2_ref,
                       o_ref, xn_ref, acc_ref, *, dim_in, n_h):
    h_idx = pl.program_id(1)

    @pl.when(h_idx == 0)
    def _():
        x = x_ref[...].astype(jnp.float32)
        xn = _layer_norm_f32(x, gamma_ref[...].astype(jnp.float32),
                             beta_ref[...].astype(jnp.float32), dim_in)
        xn_ref[...] = xn.astype(xn_ref.dtype)

    h = jnp.dot(xn_ref[...], w1_ref[...],
                preferred_element_type=jnp.float32) + b1_ref[...].astype(jnp.float32)
    g = _gelu_erf(h)
    partial = jnp.dot(g.astype(w2_ref.dtype), w2_ref[...],
                      preferred_element_type=jnp.float32)

    if n_h == 1:
        o_ref[...] = (partial + b2_ref[...].astype(jnp.float32)).astype(o_ref.dtype)
    else:
        @pl.when(h_idx == 0)
        def _():
            acc_ref[...] = partial

        @pl.when(jnp.logical_and(h_idx > 0, h_idx < n_h - 1))
        def _():
            acc_ref[...] += partial

        @pl.when(h_idx == n_h - 1)
        def _():
            o_ref[...] = (acc_ref[...] + partial +
                          b2_ref[...].astype(jnp.float32)).astype(o_ref.dtype)
    # TODO(synk): add pltpu.prng_random_bits-based dropout masks if p > 0 / training.


def feed_forward(x, gamma, beta, w1, b1, w2, b2, *,
                 tm=None, th=512, vmem_limit_bytes=None, interpret=False):
    """x: (batch, seq, dim_in) float32. Returns same shape/dtype."""
    batch, seq, dim_in = x.shape
    dim_hidden = w1.shape[1]
    M = batch * seq

    align = _device_mxu_align()                 # 256 (v6e/v7x) or 128 (<= v5)
    vmem_cap = _vmem_capacity_bytes()

    d_pad = _round_up(dim_in, align)
    h_align = _round_up(dim_hidden, align)
    th = min(_round_up(th, align), h_align)     # tile multiple of MXU width, <= hidden
    h_pad = _round_up(h_align, th)              # pad hidden up to a multiple of th
    n_h = h_pad // th

    # Resident-weight decision: bf16 w1+w2 bytes vs. per-generation VMEM budget
    # (counts a possible double-buffer of the constant weight blocks, plus tiles).
    w_bytes = 2 * d_pad * h_pad * 2             # w1 + w2 in bf16
    resident_budget = min(32 * _MIB, max(vmem_cap // 2 - 12 * _MIB, 8 * _MIB))
    resident = w_bytes <= resident_budget

    # Token tile: large enough to fill MXU rows / clear the weight-streaming
    # roofline knee when streaming; modest when weights are resident.
    if tm is None:
        tm = 256 if resident else 512
    tm_eff = min(_round_up(tm, 16), _round_up(M, 16))   # >= bf16 sublane packing
    m_pad = _round_up(M, tm_eff)
    m_tiles = m_pad // tm_eff

    # ---- pad operands (padded lanes/rows/cols are exact zeros -> math is a no-op)
    x2 = jnp.pad(x.reshape(M, dim_in), ((0, m_pad - M), (0, d_pad - dim_in)))
    gamma_p = jnp.pad(gamma, (0, d_pad - dim_in)).reshape(1, d_pad)
    beta_p = jnp.pad(beta, (0, d_pad - dim_in)).reshape(1, d_pad)
    b1_p = jnp.pad(b1, (0, h_pad - dim_hidden)).reshape(1, h_pad)
    b2_p = jnp.pad(b2, (0, d_pad - dim_in)).reshape(1, d_pad)
    w1_p = jnp.pad(w1, ((0, d_pad - dim_in), (0, h_pad - dim_hidden))).astype(jnp.bfloat16)
    w2_p = jnp.pad(w2, ((0, h_pad - dim_hidden), (0, d_pad - dim_in))).astype(jnp.bfloat16)

    # ---- VMEM limit from the real footprint (never a hard-coded 48 MiB)
    if vmem_limit_bytes is None:
        tile_io = 4 * tm_eff * d_pad * 4                       # 2x in + 2x out f32 tiles
        scratch = tm_eff * d_pad * (2 + 4)                     # xn bf16 + acc f32
        if resident:
            w_alloc = 2 * w_bytes
        else:
            w_alloc = 2 * 2 * (d_pad * th * 2)                 # double-buffered w chunks
        inter = 2 * tm_eff * th * 4                            # (tm, th) h/g intermediates
        vec_small = 8 * (d_pad + h_pad) * 4                    # biases / gamma / beta
        footprint = tile_io + scratch + w_alloc + inter + vec_small
        vmem_limit_bytes = int(min(max(footprint + 8 * _MIB, 32 * _MIB),
                                   vmem_cap * 7 // 8))

    # ---- advisory cost estimate for the XLA scheduler
    w_traffic = w_bytes if resident else m_tiles * w_bytes
    cost = pl.CostEstimate(
        flops=int(4 * m_pad * d_pad * h_pad),
        transcendentals=int(m_pad * h_pad),
        bytes_accessed=int(w_traffic + 2 * m_pad * d_pad * 4),
    )

    out_shape = jax.ShapeDtypeStruct((m_pad, d_pad), x.dtype)
    scratch_shapes = [
        pltpu.VMEM((tm_eff, d_pad), jnp.bfloat16),  # xn (LayerNorm output, bf16)
        pltpu.VMEM((tm_eff, d_pad), jnp.float32),   # second-matmul accumulator
    ]

    if resident:
        kernel = functools.partial(_ffn_resident_kernel, dim_in=dim_in,
                                   th=th, n_chunks=n_h)
        grid_spec = pltpu.PrefetchScalarGridSpec(
            num_scalar_prefetch=0,
            grid=(m_tiles,),
            in_specs=[
                pl.BlockSpec((tm_eff, d_pad), lambda i: (i, 0)),   # x tile
                pl.BlockSpec((1, d_pad), lambda i: (0, 0)),        # gamma
                pl.BlockSpec((1, d_pad), lambda i: (0, 0)),        # beta
                pl.BlockSpec((d_pad, h_pad), lambda i: (0, 0)),    # w1 (resident)
                pl.BlockSpec((1, h_pad), lambda i: (0, 0)),        # b1
                pl.BlockSpec((h_pad, d_pad), lambda i: (0, 0)),    # w2 (resident)
                pl.BlockSpec((1, d_pad), lambda i: (0, 0)),        # b2
            ],
            out_specs=pl.BlockSpec((tm_eff, d_pad), lambda i: (i, 0)),
            scratch_shapes=scratch_shapes,
        )
        dim_sem = ("parallel",)
    else:
        kernel = functools.partial(_ffn_stream_kernel, dim_in=dim_in, n_h=n_h)
        grid_spec = pltpu.PrefetchScalarGridSpec(
            num_scalar_prefetch=0,
            grid=(m_tiles, n_h),
            in_specs=[
                pl.BlockSpec((tm_eff, d_pad), lambda i, h: (i, 0)),  # x tile
                pl.BlockSpec((1, d_pad), lambda i, h: (0, 0)),       # gamma
                pl.BlockSpec((1, d_pad), lambda i, h: (0, 0)),       # beta
                pl.BlockSpec((d_pad, th), lambda i, h: (0, h)),      # w1 chunk
                pl.BlockSpec((1, th), lambda i, h: (0, h)),          # b1 chunk
                pl.BlockSpec((th, d_pad), lambda i, h: (h, 0)),      # w2 chunk
                pl.BlockSpec((1, d_pad), lambda i, h: (0, 0)),       # b2
            ],
            out_specs=pl.BlockSpec((tm_eff, d_pad), lambda i, h: (i, 0)),
            scratch_shapes=scratch_shapes,
        )
        dim_sem = ("parallel", "arbitrary")

    out2 = pl.pallas_call(
        kernel,
        out_shape=out_shape,
        grid_spec=grid_spec,
        compiler_params=pltpu.CompilerParams(
            dimension_semantics=dim_sem,
            vmem_limit_bytes=int(vmem_limit_bytes),
        ),
        cost_estimate=cost,
        interpret=interpret,
    )(x2, gamma_p, beta_p, w1_p, b1_p, w2_p, b2_p)

    return out2[:M, :dim_in].reshape(batch, seq, dim_in)


if __name__ == "__main__":
    # Small shapes consistent with the module.
    batch, seq, dim_in, dim_hidden = 2, 8, 32, 64

    key = jax.random.PRNGKey(0)
    kx, kg, kb, kw1, kb1, kw2, kb2 = jax.random.split(key, 7)

    x = jax.random.normal(kx, (batch, seq, dim_in), dtype=jnp.float32)

    gamma = 1.0 + 0.01 * jax.random.normal(kg, (dim_in,), dtype=jnp.float32)
    beta = 0.01 * jax.random.normal(kb, (dim_in,), dtype=jnp.float32)
    w1 = jax.random.normal(kw1, (dim_in, dim_hidden), dtype=jnp.float32) / jnp.sqrt(dim_in)
    b1 = 0.01 * jax.random.normal(kb1, (dim_hidden,), dtype=jnp.float32)
    w2 = jax.random.normal(kw2, (dim_hidden, dim_in), dtype=jnp.float32) / jnp.sqrt(dim_hidden)
    b2 = 0.01 * jax.random.normal(kb2, (dim_in,), dtype=jnp.float32)

    out = feed_forward(x, gamma, beta, w1, b1, w2, b2)
    out = jax.block_until_ready(out)

    # Pure-JAX reference (f32 everywhere) to guard against layout/padding bugs.
    def ref(x):
        mu = jnp.mean(x, axis=-1, keepdims=True)
        var = jnp.mean((x - mu) ** 2, axis=-1, keepdims=True)
        xn = (x - mu) / jnp.sqrt(var + LN_EPS) * gamma + beta
        h = xn @ w1 + b1
        g = 0.5 * h * (1.0 + lax.erf(h * _INV_SQRT2))
        return g @ w2 + b2

    # Tolerance reflects the accepted bf16-operand (f32-accumulate) trade-off.
    assert jnp.allclose(out, ref(x), atol=5e-2, rtol=5e-2)
    print("KERNEL_OK")
</pallas_src>

<mosaic_0001>
module attributes {stable_mosaic.version = 11 : i64} {
  func.func @_ffn_resident_kernel(%arg0: i32, %arg1: memref<16x256xf32, #tpu.memory_space<vmem>>, %arg2: memref<1x256xf32, #tpu.memory_space<vmem>>, %arg3: memref<1x256xf32, #tpu.memory_space<vmem>>, %arg4: memref<256x256xbf16, #tpu.memory_space<vmem>>, %arg5: memref<1x256xf32, #tpu.memory_space<vmem>>, %arg6: memref<256x256xbf16, #tpu.memory_space<vmem>>, %arg7: memref<1x256xf32, #tpu.memory_space<vmem>>, %arg8: memref<16x256xf32, #tpu.memory_space<vmem>>, %arg9: memref<16x256xbf16, #tpu.memory_space<vmem>>, %arg10: memref<16x256xf32, #tpu.memory_space<vmem>>) attributes {dimension_semantics = [#tpu.dimension_semantics<parallel>], iteration_bounds = array<i64: 1>, scalar_prefetch = 0 : i64, scratch_operands = 2 : i64, tpu.core_type = #tpu.core_type<tc>, window_params = [{transform_indices = @transform_0, window_bounds = array<i64: 16, 256>}, {pipeline_mode = #tpu.pipeline_mode<synchronous>, transform_indices = @transform_1, window_bounds = array<i64: 1, 256>}, {pipeline_mode = #tpu.pipeline_mode<synchronous>, transform_indices = @transform_2, window_bounds = array<i64: 1, 256>}, {pipeline_mode = #tpu.pipeline_mode<synchronous>, transform_indices = @transform_3, window_bounds = array<i64: 256, 256>}, {pipeline_mode = #tpu.pipeline_mode<synchronous>, transform_indices = @transform_4, window_bounds = array<i64: 1, 256>}, {pipeline_mode = #tpu.pipeline_mode<synchronous>, transform_indices = @transform_5, window_bounds = array<i64: 256, 256>}, {pipeline_mode = #tpu.pipeline_mode<synchronous>, transform_indices = @transform_6, window_bounds = array<i64: 1, 256>}, {transform_indices = @transform_7, window_bounds = array<i64: 16, 256>}]} {
    %c0 = arith.constant 0 : index
    %c0_0 = arith.constant 0 : index
    %0 = vector.load %arg1[%c0, %c0_0] : memref<16x256xf32, #tpu.memory_space<vmem>>, vector<16x256xf32>
    %c0_1 = arith.constant 0 : index
    %c0_2 = arith.constant 0 : index
    %1 = vector.load %arg2[%c0_1, %c0_2] : memref<1x256xf32, #tpu.memory_space<vmem>>, vector<1x256xf32>
    %c0_3 = arith.constant 0 : index
    %c0_4 = arith.constant 0 : index
    %2 = vector.load %arg3[%c0_3, %c0_4] : memref<1x256xf32, #tpu.memory_space<vmem>>, vector<1x256xf32>
    %cst = arith.constant dense<0.000000e+00> : vector<16xf32>
    %3 = vector.multi_reduction <add>, %0, %cst [1] : vector<16x256xf32> to vector<16xf32>
    %4 = vector.shape_cast %3 : vector<16xf32> to vector<16x1xf32>
    %cst_5 = arith.constant 3.125000e-02 : f32
    %5 = vector.broadcast %cst_5 : f32 to vector<16x1xf32>
    %6 = arith.mulf %4, %5 : vector<16x1xf32>
    %7 = vector.broadcast %6 : vector<16x1xf32> to vector<16x256xf32>
    %8 = arith.subf %0, %7 : vector<16x256xf32>
    %9 = tpu.iota {dimensions = array<i32: 1>} : vector<16x256xi32>
    %c32_i32 = arith.constant 32 : i32
    %10 = vector.broadcast %c32_i32 : i32 to vector<16x256xi32>
    %11 = arith.cmpi slt, %9, %10 : vector<16x256xi32>
    %cst_6 = arith.constant 0.000000e+00 : f32
    %12 = vector.broadcast %cst_6 : f32 to vector<16x256xf32>
    %13 = arith.select %11, %8, %12 : vector<16x256xi1>, vector<16x256xf32>
    %14 = arith.mulf %13, %13 : vector<16x256xf32>
    %cst_7 = arith.constant dense<0.000000e+00> : vector<16xf32>
    %15 = vector.multi_reduction <add>, %14, %cst_7 [1] : vector<16x256xf32> to vector<16xf32>
    %16 = vector.shape_cast %15 : vector<16xf32> to vector<16x1xf32>
    %cst_8 = arith.constant 3.125000e-02 : f32
    %17 = vector.broadcast %cst_8 : f32 to vector<16x1xf32>
    %18 = arith.mulf %16, %17 : vector<16x1xf32>
    %cst_9 = arith.constant 9.99999974E-6 : f32
    %19 = vector.broadcast %cst_9 : f32 to vector<16x1xf32>
    %20 = arith.addf %18, %19 : vector<16x1xf32>
    %21 = math.rsqrt %20 : vector<16x1xf32>
    %22 = vector.broadcast %21 : vector<16x1xf32> to vector<16x256xf32>
    %23 = arith.mulf %13, %22 : vector<16x256xf32>
    %24 = vector.broadcast %1 : vector<1x256xf32> to vector<16x256xf32>
    %25 = arith.mulf %23, %24 : vector<16x256xf32>
    %26 = vector.broadcast %2 : vector<1x256xf32> to vector<16x256xf32>
    %27 = arith.addf %25, %26 : vector<16x256xf32>
    %28 = arith.truncf %27 : vector<16x256xf32> to vector<16x256xbf16>
    %c0_10 = arith.constant 0 : index
    %c0_11 = arith.constant 0 : index
    %29 = vector.load %arg9[%c0_10, %c0_11] : memref<16x256xbf16, #tpu.memory_space<vmem>>, vector<16x256xbf16>
    tpu.vector_store %arg9[%c0_10, %c0_11], %28 {strides = array<i32>} : memref<16x256xbf16, #tpu.memory_space<vmem>>, vector<16x256xbf16>,
    %c0_12 = arith.constant 0 : index
    %c0_13 = arith.constant 0 : index
    %30 = vector.load %arg7[%c0_12, %c0_13] : memref<1x256xf32, #tpu.memory_space<vmem>>, vector<1x256xf32>
    %c0_14 = arith.constant 0 : index
    %c0_15 = arith.constant 0 : index
    %31 = vector.load %arg9[%c0_14, %c0_15] : memref<16x256xbf16, #tpu.memory_space<vmem>>, vector<16x256xbf16>
    %c0_16 = arith.constant 0 : index
    %c0_17 = arith.constant 0 : index
    %32 = vector.load %arg4[%c0_16, %c0_17] : memref<256x256xbf16, #tpu.memory_space<vmem>>, vector<256x256xbf16>
    %cst_18 = arith.constant dense<0.000000e+00> : vector<16x256xf32>
    %33 = tpu.matmul %31, %32, %cst_18 {dimension_numbers = #tpu.dot_dimension_numbers<[1], [0], [0], [1], [0, 0, 1, 1], [], []>} : vector<16x256xbf16>, vector<256x256xbf16>, vector<16x256xf32> -> vector<16x256xf32>
    %c0_19 = arith.constant 0 : index
    %c0_20 = arith.constant 0 : index
    %34 = vector.load %arg5[%c0_19, %c0_20] : memref<1x256xf32, #tpu.memory_space<vmem>>, vector<1x256xf32>
    %35 = vector.broadcast %34 : vector<1x256xf32> to vector<16x256xf32>
    %36 = arith.addf %33, %35 : vector<16x256xf32>
    %cst_21 = arith.constant 5.000000e-01 : f32
    %37 = vector.broadcast %cst_21 : f32 to vector<16x256xf32>
    %38 = arith.mulf %37, %36 : vector<16x256xf32>
    %cst_22 = arith.constant 0.707106769 : f32
    %39 = vector.broadcast %cst_22 : f32 to vector<16x256xf32>
    %40 = arith.mulf %36, %39 : vector<16x256xf32>
    %41 = math.erf %40 : vector<16x256xf32>
    %cst_23 = arith.constant 1.000000e+00 : f32
    %42 = vector.broadcast %cst_23 : f32 to vector<16x256xf32>
    %43 = arith.addf %42, %41 : vector<16x256xf32>
    %44 = arith.mulf %38, %43 : vector<16x256xf32>
    %45 = arith.truncf %44 : vector<16x256xf32> to vector<16x256xbf16>
    %c0_24 = arith.constant 0 : index
    %c0_25 = arith.constant 0 : index
    %46 = vector.load %arg6[%c0_24, %c0_25] : memref<256x256xbf16, #tpu.memory_space<vmem>>, vector<256x256xbf16>
    %cst_26 = arith.constant dense<0.000000e+00> : vector<16x256xf32>
    %47 = tpu.matmul %45, %46, %cst_26 {dimension_numbers = #tpu.dot_dimension_numbers<[1], [0], [0], [1], [0, 0, 1, 1], [], []>} : vector<16x256xbf16>, vector<256x256xbf16>, vector<16x256xf32> -> vector<16x256xf32>
    %48 = vector.broadcast %30 : vector<1x256xf32> to vector<16x256xf32>
    %49 = arith.addf %47, %48 : vector<16x256xf32>
    %c0_27 = arith.constant 0 : index
    %c0_28 = arith.constant 0 : index
    %50 = vector.load %arg8[%c0_27, %c0_28] : memref<16x256xf32, #tpu.memory_space<vmem>>, vector<16x256xf32>
    tpu.vector_store %arg8[%c0_27, %c0_28], %49 {strides = array<i32>} : memref<16x256xf32, #tpu.memory_space<vmem>>, vector<16x256xf32>,
    return
  }
  func.func @transform_0(%arg0: i32) -> (i32, i32) {
    %c0_i32 = arith.constant 0 : i32
    %c0_i32_0 = arith.constant 0 : i32
    return %arg0, %c0_i32 : i32, i32
  }
  func.func @transform_1(%arg0: i32) -> (i32, i32) {
    %c0_i32 = arith.constant 0 : i32
    %c0_i32_0 = arith.constant 0 : i32
    %c0_i32_1 = arith.constant 0 : i32
    return %c0_i32, %c0_i32_0 : i32, i32
  }
  func.func @transform_2(%arg0: i32) -> (i32, i32) {
    %c0_i32 = arith.constant 0 : i32
    %c0_i32_0 = arith.constant 0 : i32
    %c0_i32_1 = arith.constant 0 : i32
    return %c0_i32, %c0_i32_0 : i32, i32
  }
  func.func @transform_3(%arg0: i32) -> (i32, i32) {
    %c0_i32 = arith.constant 0 : i32
    %c0_i32_0 = arith.constant 0 : i32
    %c0_i32_1 = arith.constant 0 : i32
    return %c0_i32, %c0_i32_0 : i32, i32
  }
  func.func @transform_4(%arg0: i32) -> (i32, i32) {
    %c0_i32 = arith.constant 0 : i32
    %c0_i32_0 = arith.constant 0 : i32
    %c0_i32_1 = arith.constant 0 : i32
    return %c0_i32, %c0_i32_0 : i32, i32
  }
  func.func @transform_5(%arg0: i32) -> (i32, i32) {
    %c0_i32 = arith.constant 0 : i32
    %c0_i32_0 = arith.constant 0 : i32
    %c0_i32_1 = arith.constant 0 : i32
    return %c0_i32, %c0_i32_0 : i32, i32
  }
  func.func @transform_6(%arg0: i32) -> (i32, i32) {
    %c0_i32 = arith.constant 0 : i32
    %c0_i32_0 = arith.constant 0 : i32
    %c0_i32_1 = arith.constant 0 : i32
    return %c0_i32, %c0_i32_0 : i32, i32
  }
  func.func @transform_7(%arg0: i32) -> (i32, i32) {
    %c0_i32 = arith.constant 0 : i32
    %c0_i32_0 = arith.constant 0 : i32
    return %arg0, %c0_i32 : i32, i32
  }
}

</mosaic_0001>

<bundles_post_ra>
// kernel: tpu_custom_call.1
= control target key start
LH: loop header
LB: loop body
LE: loop exit
PB: predicated region body
PF: predicated region fallthrough
CT: control target
= control target key end

     0   :  { %12 = vsyncpa [#allocation5], 0  ;;  %s1672_s0 = inlined_call_operand.hbm [shape: f32[16,256], index: 0, kind: input, shape index: {}]   ;;  %s1673_s1 = inlined_call_operand.hbm [shape: f32[1,256], index: 1, kind: input, shape index: {}]   ;;  %s1674_s2 = inlined_call_operand.hbm [shape: f32[1,256], index: 2, kind: input, shape index: {}]   ;;  %s1675_s3 = inlined_call_operand.hbm [shape: bf16[256,256], index: 3, kind: input, shape index: {}]   ;;  %s1676_s4 = inlined_call_operand.vmem [shape: f32[1,256], index: 4, kind: input, shape index: {}]   ;;  %s1677_s5 = inlined_call_operand.hbm [shape: bf16[256,256], index: 5, kind: input, shape index: {}]   ;;  %s1678_s6 = inlined_call_operand.vmem [shape: f32[1,256], index: 6, kind: input, shape index: {}]   ;;  %s1679_s7 = inlined_call_operand.hbm [shape: f32[16,256], index: 7, kind: output, shape index: {}]  }
   0x1   :  { %13 = vsyncpa [#allocation8], 0 }
   0x2   :  { %14 = vsyncpa [#allocation11], 0  ;;  %s34_s26 = sshll.u32 %s1673_s1, 4  ;;  %s35_s26 = int_to_ptr.hbm [resolvable:$true] %s34_s26 }
   0x3   :  { %15 = vsyncpa [#allocation6], 0  ;;  %s1419_s27 = smov [#allocation7]   ;;  %s55_s8 = sshll.u32 %s1675_s3, 4  ;;  %s56_s8 = int_to_ptr.hbm [resolvable:$true] %s55_s8 }
   0x4   :  { %s36_s28 = sshll.u32 %s1419_s27, 4  ;;  %s1420_s9 = smov [#allocation10]   ;;  %s37_s28 = int_to_ptr.vmem [resolvable:$true] %s36_s28 }
   0x5   :  { %39 = dma.hbm_to_vmem [thread:$0]  %s35_s26, 32, %s37_s28, [#allocation8]  }
   0x6   :  { %s57_s10 = sshll.u32 %s1420_s9, 4  ;;  %s1421_s11 = smov 128   ;;  %s58_s10 = int_to_ptr.vmem [resolvable:$true] %s57_s10 }
   0x7   :  { %s1422_s12 = smov 8   ;;  %s20_s1 = sshll.u32 %s1672_s0, 4  ;;  %s21_s1 = int_to_ptr.hbm [resolvable:$true] %s20_s1 }
   0x8   :  { %63 = dma.hbm_to_vmem [thread:$0]  %s56_s8, 4096, %s58_s10, [#allocation11], %s1421_s11, %s1421_s11, %s1422_s12  }
   0x9   :  { %s1423_s15 = smov [#allocation4]   ;;  %s45_s3 = sshll.u32 %s1674_s2, 4  ;;  %s46_s3 = int_to_ptr.hbm [resolvable:$true] %s45_s3 }
   0xa   :  { %s22_s16 = sshll.u32 %s1423_s15, 4  ;;  %s1424_s19 = smov 256   ;;  %s23_s16 = int_to_ptr.vmem [resolvable:$true] %s22_s16 }
   0xb   :  { %s1425_s20 = smov 16   ;;  %s1426_s21 = smov [#allocation9]  }
   0xc   :  { %28 = dma.hbm_to_vmem [thread:$0]  %s21_s1, 512, %s23_s16, [#allocation5], %s1424_s19, %s1424_s19, %s1425_s20  }
   0xd   :  { %s47_s22 = sshll.u32 %s1426_s21, 4  ;;  %s70_s0 = sshll.u32 %s1677_s5, 4  ;;  %s48_s22 = int_to_ptr.vmem [resolvable:$true] %s47_s22  ;;  %s71_s0 = int_to_ptr.hbm [resolvable:$true] %s70_s0 }
   0xe   :  { %50 = dma.hbm_to_vmem [thread:$0]  %s46_s3, 32, %s48_s22, [#allocation8]  }
   0xf   :  { %s1427_s25 = smov [#allocation12]  }
  0x10   :  { %s72_s26 = sshll.u32 %s1427_s25, 4  ;;  %s73_s26 = int_to_ptr.vmem [resolvable:$true] %s72_s26 }
  0x11   :  { %78 = dma.hbm_to_vmem [thread:$0]  %s71_s0, 4096, %s73_s26, [#allocation11], %s1421_s11, %s1421_s11, %s1422_s12  }
  0x12   :  { %1411 = dma.done.wait [#allocation5], 512  }
  0x13   :  { %1412 = vsyncadd [#allocation5], 4294966784 }
  0x14   :  { %1413 = dma.done.wait [#allocation8], 64  }
  0x15   :  { %1414 = vsyncadd [#allocation8], 4294967232 }
  0x16   :  { %1415 = dma.done.wait [#allocation11], 8192  }
  0x17   :  { %1416 = vsyncadd [#allocation11], 4294959104  ;;  %v101_v0 = vld [vmem:[#allocation4] sm:$0xff]  ;;  %v102_v1 = vld [vmem:[#allocation4 + $0x8] sm:$0xff]  ;;  %v119_v6 = vlaneseq  ;;  %s1428_s28 = smov [#allocation13]   ;;  %s896_s8 = sshll.u32 %s1679_s7, 4  ;;  %s897_s8 = int_to_ptr.hbm [resolvable:$true] %s896_s8 }
  0x18   :  { %v107_v2 = vadd.f32 %v102_v1, %v101_v0  ;;  %v103_v3 = vld [vmem:[#allocation4 + $0x10] sm:$0xff]  ;;  %v104_v4 = vld [vmem:[#allocation4 + $0x18] sm:$0xff]  ;;  %v979_v24 = vld [vmem:[#allocation10 + $0x78] sm:$0xf0] }
  0x19   :  { %v110_v5 = vadd.f32 %v104_v4, %v103_v3  ;;  %v120_v7 = vand.u32 127, %v119_v6  ;;  %v977_v18 = vld [vmem:[#allocation10 + $0x70] sm:$0xf]  ;;  %v1196_v19 = vld [vmem:[#allocation10 + $0x74] sm:$0xf0] }
  0x1a   :  { %108 = vadd.xlane.f32.xlu0 %v107_v2  ;;  %v1041_v20 = vld [vmem:[#allocation10 + $0xf0] sm:$0xf]  ;;  %v978_v21 = vor.u32 %v1196_v19, %v977_v18  ;;  %v1212_v22 = vld [vmem:[#allocation10 + $0xf4] sm:$0xf0]  ;;  %v1195_v23 = vld [vmem:[#allocation10 + $0x74] sm:$0xf] }
  0x1b   :  { %vm122_vm0 = vcmp.lt.s32.totalorder %v120_v7, 32  ;;  %v1042_v25 = vor.u32 %v1212_v22, %v1041_v20  ;;  %v982_v26 = vor.u32 %v1195_v23, %v979_v24  ;;  %v1211_v27 = vld [vmem:[#allocation10 + $0xf4] sm:$0xf]  ;;  %v1043_v28 = vld [vmem:[#allocation10 + $0xf8] sm:$0xf0] }
  0x1c   :  { %399 = vmatpush.bf16.msra.mxu0 %v978_v21  ;;  %v1046_v29 = vor.u32 %v1211_v27, %v1043_v28  ;;  %v969_v30 = vld [vmem:[#allocation10 + $0x60] sm:$0xf]  ;;  %v1194_v31 = vld [vmem:[#allocation10 + $0x64] sm:$0xf0]  ;;  %v1193_v35 = vld [vmem:[#allocation10 + $0x64] sm:$0xf] }
  0x1d   :  { %413 = vmatpush.bf16.msra.mxu1 %v1042_v25  ;;  %427 = vmatpush.bf16.msra.mxu2 %v982_v26  ;;  %v1033_v32 = vld [vmem:[#allocation10 + $0xe0] sm:$0xf]  ;;  %v970_v33 = vor.u32 %v1194_v31, %v969_v30  ;;  %v1210_v34 = vld [vmem:[#allocation10 + $0xe4] sm:$0xf0]  ;;  %v971_v36 = vld [vmem:[#allocation10 + $0x68] sm:$0xf0] }
  0x1e   :  { %441 = vmatpush.bf16.msra.mxu3 %v1046_v29  ;;  %v1034_v37 = vor.u32 %v1210_v34, %v1033_v32  ;;  %v974_v38 = vor.u32 %v1193_v35, %v971_v36  ;;  %v1209_v39 = vld [vmem:[#allocation10 + $0xe4] sm:$0xf]  ;;  %v1035_v40 = vld [vmem:[#allocation10 + $0xe8] sm:$0xf0]  ;;  %v961_v42 = vld [vmem:[#allocation10 + $0x50] sm:$0xf] }
  0x1f   :  { %v1038_v41 = vor.u32 %v1209_v39, %v1035_v40  ;;  %v1192_v43 = vld [vmem:[#allocation10 + $0x54] sm:$0xf0]  ;;  %v1025_v44 = vld [vmem:[#allocation10 + $0xd0] sm:$0xf]  ;;  %v1191_v47 = vld [vmem:[#allocation10 + $0x54] sm:$0xf] }
  0x20   :  { %400 = vmatpush.bf16.msra.mxu0 %v970_v33  ;;  %v962_v45 = vor.u32 %v1192_v43, %v961_v42  ;;  %v1208_v46 = vld [vmem:[#allocation10 + $0xd4] sm:$0xf0]  ;;  %v963_v48 = vld [vmem:[#allocation10 + $0x58] sm:$0xf0]  ;;  %v1207_v51 = vld [vmem:[#allocation10 + $0xd4] sm:$0xf] }
  0x21   :  { %414 = vmatpush.bf16.msra.mxu1 %v1034_v37  ;;  %428 = vmatpush.bf16.msra.mxu2 %v974_v38  ;;  %v1026_v49 = vor.u32 %v1208_v46, %v1025_v44  ;;  %v966_v50 = vor.u32 %v1191_v47, %v963_v48  ;;  %v1027_v52 = vld [vmem:[#allocation10 + $0xd8] sm:$0xf0]  ;;  %v953_v54 = vld [vmem:[#allocation10 + $0x40] sm:$0xf]  ;;  %v1190_v55 = vld [vmem:[#allocation10 + $0x44] sm:$0xf0] }
  0x22   :  { %111 = vadd.xlane.f32.xlu0 %v110_v5  ;;  %442 = vmatpush.bf16.msra.mxu3 %v1038_v41  ;;  %v1030_v53 = vor.u32 %v1207_v51, %v1027_v52  ;;  %v1017_v56 = vld [vmem:[#allocation10 + $0xc0] sm:$0xf]  ;;  %v954_v57 = vor.u32 %v1190_v55, %v953_v54  ;;  %v1206_v58 = vld [vmem:[#allocation10 + $0xc4] sm:$0xf0]  ;;  %v1189_v59 = vld [vmem:[#allocation10 + $0x44] sm:$0xf] }
  0x23   :  { %v955_v60 = vld [vmem:[#allocation10 + $0x48] sm:$0xf0]  ;;  %v1018_v61 = vor.u32 %v1206_v58, %v1017_v56  ;;  %v1205_v63 = vld [vmem:[#allocation10 + $0xc4] sm:$0xf]  ;;  %v945_v2 = vld [vmem:[#allocation10 + $0x30] sm:$0xf] }
  0x24   :  { %401 = vmatpush.bf16.msra.mxu0 %v962_v45  ;;  %v958_v62 = vor.u32 %v1189_v59, %v955_v60  ;;  %v1009_v4 = vld [vmem:[#allocation10 + $0xb0] sm:$0xf]  ;;  %v1204_v7 = vld [vmem:[#allocation10 + $0xb4] sm:$0xf0]  ;;  %v937_v19 = vld [vmem:[#allocation10 + $0x20] sm:$0xf] }
  0x25   :  { %415 = vmatpush.bf16.msra.mxu1 %v1026_v49  ;;  %429 = vmatpush.bf16.msra.mxu2 %v966_v50  ;;  %v1186_v20 = vld [vmem:[#allocation10 + $0x24] sm:$0xf0]  ;;  %v1001_v22 = vld [vmem:[#allocation10 + $0xa0] sm:$0xf]  ;;  %v1185_v24 = vld [vmem:[#allocation10 + $0x24] sm:$0xf] }
  0x26   :  { %443 = vmatpush.bf16.msra.mxu3 %v1030_v53  ;;  %v938_v21 = vor.u32 %v1186_v20, %v937_v19  ;;  %v1202_v23 = vld [vmem:[#allocation10 + $0xa4] sm:$0xf0]  ;;  %v939_v26 = vld [vmem:[#allocation10 + $0x28] sm:$0xf0]  ;;  %v1201_v27 = vld [vmem:[#allocation10 + $0xa4] sm:$0xf] }
  0x27   :  { %v1002_v25 = vor.u32 %v1202_v23, %v1001_v22  ;;  %v1003_v28 = vld [vmem:[#allocation10 + $0xa8] sm:$0xf0]  ;;  %v942_v29 = vor.u32 %v1185_v24, %v939_v26  ;;  %v929_v31 = vld [vmem:[#allocation10 + $0x10] sm:$0xf]  ;;  %v1184_v32 = vld [vmem:[#allocation10 + $0x14] sm:$0xf0] }
  0x28   :  { %402 = vmatpush.bf16.msra.mxu0 %v954_v57  ;;  %v1006_v30 = vor.u32 %v1201_v27, %v1003_v28  ;;  %v993_v33 = vld [vmem:[#allocation10 + $0x90] sm:$0xf]  ;;  %v930_v35 = vor.u32 %v1184_v32, %v929_v31  ;;  %v1200_v36 = vld [vmem:[#allocation10 + $0x94] sm:$0xf0]  ;;  %v1183_v37 = vld [vmem:[#allocation10 + $0x14] sm:$0xf] }
  0x29   :  { %416 = vmatpush.bf16.msra.mxu1 %v1018_v61  ;;  %430 = vmatpush.bf16.msra.mxu2 %v958_v62  ;;  %v931_v38 = vld [vmem:[#allocation10 + $0x18] sm:$0xf0]  ;;  %v994_v40 = vor.u32 %v1200_v36, %v993_v33  ;;  %v1199_v42 = vld [vmem:[#allocation10 + $0x94] sm:$0xf]  ;;  %v921_v45 = vld [vmem:[#allocation10] sm:$0xf] }
  0x2a   :  { %v934_v41 = vor.u32 %v1183_v37, %v931_v38  ;;  %v995_v43 = vld [vmem:[#allocation10 + $0x98] sm:$0xf0]  ;;  %v1182_v46 = vld [vmem:[#allocation10 + $0x4] sm:$0xf0]  ;;  %v985_v47 = vld [vmem:[#allocation10 + $0x80] sm:$0xf] }
  0x2b   :  { %v998_v44 = vor.u32 %v1199_v42, %v995_v43  ;;  %v922_v50 = vor.u32 %v1182_v46, %v921_v45  ;;  %v1198_v51 = vld [vmem:[#allocation10 + $0x84] sm:$0xf0]  ;;  %v1181_v52 = vld [vmem:[#allocation10 + $0x4] sm:$0xf]  ;;  %v923_v55 = vld [vmem:[#allocation10 + $0x8] sm:$0xf0] }
  0x2c   :  { %v986_v54 = vor.u32 %v1198_v51, %v985_v47  ;;  %v1197_v56 = vld [vmem:[#allocation10 + $0x84] sm:$0xf]  ;;  %v987_v57 = vld [vmem:[#allocation10 + $0x88] sm:$0xf0]  ;;  %v926_v58 = vor.u32 %v1181_v52, %v923_v55  ;;  %v105_v62 = vld [vmem:[#allocation7] sm:$0x3] }
  0x2d   :  { %v990_v59 = vor.u32 %v1197_v56, %v987_v57  ;;  %v1228_v56 = vld [vmem:[#allocation12 + $0x74] sm:$0xf0] }
  0x8d   :  { %v109_v8 = vpop.xlane.xlu0 %108 }
  0x8e   :  { %v113_v9 = vmul.f32 0.03125, %v109_v8  ;;  %v1187_v8 = vld [vmem:[#allocation10 + $0x34] sm:$0xf] }
  0x90   :  { %v115_v10 = vsub.f32 %v101_v0, %v113_v9  ;;  %v1019_v0 = vld [vmem:[#allocation10 + $0xc8] sm:$0xf0]  ;;  %v947_v9 = vld [vmem:[#allocation10 + $0x38] sm:$0xf0] }
  0x91   :  { %v1022_v1 = vor.u32 %v1205_v63, %v1019_v0 }
  0x92   :  { %v1487_v11 = vsel %vm122_vm0, %v115_v10, 0.0 }
  0x93   :  { %v128_v12 = vmul.f32 %v1487_v11, %v1487_v11  ;;  %444 = vmatpush.bf16.msra.mxu3 %v1022_v1  ;;  %v106_v1 = vld [vmem:[#allocation9] sm:$0x3] }
  0x95   :  { %133 = vadd.xlane.f32.xlu1 %v128_v12  ;;  %v112_v13 = vpop.xlane.xlu0 %111  ;;  %v1010_v12 = vor.u32 %v1204_v7, %v1009_v4  ;;  %v167_v4 = vperm.slane %v105_v62, 0 }
  0x96   :  { %v114_v14 = vmul.f32 0.03125, %v112_v13  ;;  %v950_v13 = vor.u32 %v1187_v8, %v947_v9  ;;  %v176_v8 = vperm.slane %v106_v1, 0  ;;  %v177_v9 = vperm.slane %v106_v1, 1 }
  0x97   :  { %417 = vmatpush.bf16.msra.mxu1 %v1010_v12 }
  0x98   :  { %v117_v15 = vsub.f32 %v103_v3, %v114_v14  ;;  %v1188_v3 = vld [vmem:[#allocation10 + $0x34] sm:$0xf0]  ;;  %v1203_v14 = vld [vmem:[#allocation10 + $0xb4] sm:$0xf]  ;;  %431 = vmatpush.bf16.msra.mxu2 %v950_v13 }
  0x99   :  { %v946_v6 = vor.u32 %v1188_v3, %v945_v2 }
  0x9a   :  { %v1491_v16 = vsel %vm122_vm0, %v117_v15, 0.0  ;;  %v1011_v15 = vld [vmem:[#allocation10 + $0xb8] sm:$0xf0] }
  0x9b   :  { %v130_v17 = vmul.f32 %v1491_v16, %v1491_v16  ;;  %403 = vmatpush.bf16.msra.mxu0 %v946_v6  ;;  %418 = vmatpush.bf16.msra.mxu1 %v1002_v25 }
  0x9c   :  { %432 = vmatpush.bf16.msra.mxu2 %v942_v29 }
  0x9d   :  { %136 = vadd.xlane.f32.xlu1 %v130_v17  ;;  %v1014_v17 = vor.u32 %v1203_v14, %v1011_v15 }
  0x9f   :  { %445 = vmatpush.bf16.msra.mxu3 %v1014_v17  ;;  %404 = vmatpush.bf16.msra.mxu0 %v938_v21 }
  0xa0   :  { %419 = vmatpush.bf16.msra.mxu1 %v994_v40  ;;  %433 = vmatpush.bf16.msra.mxu2 %v934_v41 }
  0xa3   :  { %446 = vmatpush.bf16.msra.mxu3 %v1006_v30  ;;  %405 = vmatpush.bf16.msra.mxu0 %v930_v35 }
  0xa4   :  { %420 = vmatpush.bf16.msra.mxu1 %v986_v54  ;;  %434 = vmatpush.bf16.msra.mxu2 %v926_v58  ;;  %v1109_v54 = vld [vmem:[#allocation12 + $0x70] sm:$0xf] }
  0xa7   :  { %447 = vmatpush.bf16.msra.mxu3 %v998_v44  ;;  %406 = vmatpush.bf16.msra.mxu0 %v922_v50 }
  0xab   :  { %448 = vmatpush.bf16.msra.mxu3 %v990_v59  ;;  %v1110_v59 = vor.u32 %v1228_v56, %v1109_v54  ;;  %v1095_v56 = vld [vmem:[#allocation12 + $0x58] sm:$0xf0] }
  0xad   :  { %830 = vmatpush.bf16.msrb.mxu0 %v1110_v59 }
 0x108   :  { %v134_v5 = vpop.xlane.xlu1 %133 }
 0x109   :  { %v138_v10 = vmul.f32 0.03125, %v134_v5  ;;  %v168_v5 = vperm.slane %v105_v62, 1  ;;  %v1227_v62 = vld [vmem:[#allocation12 + $0x74] sm:$0xf] }
 0x10b   :  { %v1495_v18 = vadd.f32 1e-05, %v138_v10 }
 0x10d   :  { %1255 = vrsqrt.f32 %v1495_v18  ;;  %vm148_vm2 = vweird.f32 %v1495_v18 }
 0x110   :  { %v137_v34 = vpop.xlane.xlu1 %136 }
 0x111   :  { %v139_v39 = vmul.f32 0.03125, %v137_v34 }
 0x113   :  { %v1256_v48 = vpop.eup %1255  ;;  %v141_v49 = vadd.f32 1e-05, %v139_v39 }
 0x114   :  { %v143_v53 = vmul.f32 %v1256_v48, %v1495_v18  ;;  %vm149_vm1 = vweird.f32 %v1256_v48 }
 0x115   :  { %1257 = vrsqrt.f32 %v141_v49  ;;  %vm150_vm3 = vmor %vm148_vm2, %vm149_vm1  ;;  %vm158_vm5 = vweird.f32 %v141_v49 }
 0x116   :  { %v144_v60 = vmul.f32 %v1256_v48, %v143_v53 }
 0x118   :  { %v145_v61 = vmul.f32 0.5, %v144_v60 }
 0x11a   :  { %v146_v63 = vsub.f32 1.5, %v145_v61 }
 0x11b   :  { %v1258_v0 = vpop.eup %1257 }
 0x11c   :  { %v147_v2 = vmul.f32 %v1256_v48, %v146_v63  ;;  %v153_v3 = vmul.f32 %v1258_v0, %v141_v49  ;;  %vm159_vm4 = vweird.f32 %v1258_v0  ;;  %v1111_v63 = vld [vmem:[#allocation12 + $0x78] sm:$0xf0] }
 0x11d   :  { %vm160_vm6 = vmor %vm158_vm5, %vm159_vm4 }
 0x11e   :  { %v151_v6 = vsel %vm150_vm3, %v1256_v48, %v147_v2  ;;  %v154_v7 = vmul.f32 %v1258_v0, %v153_v3  ;;  %v1114_v3 = vor.u32 %v1227_v62, %v1111_v63  ;;  %v1242_v62 = vld [vmem:[#allocation12 + $0xe4] sm:$0xf0] }
 0x11f   :  { %v162_v10 = vmul.f32 %v151_v6, %v1487_v11  ;;  %v163_v12 = vmul.f32 0.0, %v151_v6  ;;  %v1225_v6 = vld [vmem:[#allocation12 + $0x64] sm:$0xf] }
 0x120   :  { %v155_v13 = vmul.f32 0.5, %v154_v7  ;;  %858 = vmatpush.bf16.msrb.mxu2 %v1114_v3 }
 0x121   :  { %v171_v14 = vmul.f32 %v167_v4, %v162_v10  ;;  %v172_v15 = vmul.f32 %v168_v5, %v163_v12  ;;  %v1103_v12 = vld [vmem:[#allocation12 + $0x68] sm:$0xf0] }
 0x122   :  { %v156_v17 = vsub.f32 1.5, %v155_v13 }
 0x123   :  { %v180_v19 = vadd.f32 %v176_v8, %v171_v14  ;;  %v181_v20 = vadd.f32 %v177_v9, %v172_v15  ;;  %v1106_v15 = vor.u32 %v1225_v6, %v1103_v12 }
 0x124   :  { %v157_v21 = vmul.f32 %v1258_v0, %v156_v17  ;;  %v1173_v17 = vld [vmem:[#allocation12 + $0xf0] sm:$0xf] }
 0x125   :  { %v184_v18 = vpack.c.bf16 %v181_v20, %v180_v19  ;;  %859 = vmatpush.bf16.msrb.mxu2 %v1106_v15 }
 0x126   :  { %v161_v22 = vsel %vm160_vm6, %v1258_v0, %v157_v21 }
 0x127   :  { %186 = vst [vmem:[#allocation2] sm:$0xff] %v184_v18  ;;  %v164_v23 = vmul.f32 %v161_v22, %v1491_v16  ;;  %v165_v24 = vmul.f32 0.0, %v161_v22  ;;  %v223_v16 = vld [vmem:[%s1676_s4] sm:$0x3] }
 0x128   :  { %v225_v35 = vperm.slane %v223_v16, 0  ;;  %v226_v40 = vperm.slane %v223_v16, 1 }
 0x129   :  { %v173_v25 = vmul.f32 %v167_v4, %v164_v23  ;;  %v174_v26 = vmul.f32 %v168_v5, %v165_v24  ;;  %v1101_v4 = vld [vmem:[#allocation12 + $0x60] sm:$0xf]  ;;  %v1226_v5 = vld [vmem:[#allocation12 + $0x64] sm:$0xf0] }
 0x12a   :  { %v1102_v10 = vor.u32 %v1226_v5, %v1101_v4 }
 0x12b   :  { %v182_v11 = vadd.f32 %v176_v8, %v173_v25  ;;  %v183_v27 = vadd.f32 %v177_v9, %v174_v26  ;;  %v1244_v25 = vld [vmem:[#allocation12 + $0xf4] sm:$0xf0]  ;;  %v1243_v26 = vld [vmem:[#allocation12 + $0xf4] sm:$0xf] }
 0x12c   :  { %831 = vmatpush.bf16.msrb.mxu0 %v1102_v10 }
 0x12d   :  { %v185_v28 = vpack.c.bf16 %v183_v27, %v182_v11  ;;  %v1175_v11 = vld [vmem:[#allocation12 + $0xf8] sm:$0xf0] }
 0x12e   :  { %v913_v29 = vld [vmem:[#allocation2] sm:$0xf]  ;;  %v1179_v31 = vld [vmem:[#allocation2 + $0x4] sm:$0xf] }
 0x12f   :  { %187 = vst [vmem:[#allocation2 + $0x8] sm:$0xff] %v185_v28 }
 0x136   :  { %v1180_v30 = vld [vmem:[#allocation2 + $0x4] sm:$0xf0]  ;;  %v915_v32 = vld [vmem:[#allocation2 + $0x8] sm:$0xf0] }
 0x137   :  { %v914_v33 = vor.u32 %v1180_v30, %v913_v29  ;;  %v918_v34 = vor.u32 %v1179_v31, %v915_v32  ;;  %v1174_v30 = vor.u32 %v1244_v25, %v1173_v17 }
 0x139   :  { %407 = vmatmul.bf16.vlgmr.msra.gmra.mxu0 %v914_v33  ;;  %421 = vmatmul.bf16.vlgmr.msra.gmra.mxu1 %v918_v34 }
 0x13a   :  { %435 = vmatmul.bf16.vlgmr.msra.gmra.mxu2 %v914_v33  ;;  %449 = vmatmul.bf16.vlgmr.msra.gmra.mxu3 %v918_v34  ;;  %v1178_v34 = vor.u32 %v1243_v26, %v1175_v11  ;;  %v1221_v11 = vld [vmem:[#allocation12 + $0x44] sm:$0xf] }
 0x13b   :  { %844 = vmatpush.bf16.msrb.mxu1 %v1174_v30 }
 0x13c   :  { %872 = vmatpush.bf16.msrb.mxu3 %v1178_v34  ;;  %v1240_v34 = vld [vmem:[#allocation12 + $0xd4] sm:$0xf0] }
 0x1b6   :  { %v408_v36 = vpop.f32.mrf.mxu0  ;;  %v422_v37 = vpop.f32.mrf.mxu1 }
 0x1b7   :  { %v409_v38 = vadd.f32 %v408_v36, %v225_v35  ;;  %v1093_v36 = vld [vmem:[#allocation12 + $0x50] sm:$0xf] }
 0x1b9   :  { %v1505_v39 = vadd.f32 %v422_v37, %v409_v38 }
 0x1bb   :  { %v1508_v41 = vmul.f32 0.70710677, %v1505_v39 }
 0x1bd   :  { %v463_v42 = vmul.f32 %v1508_v41, %v1508_v41  ;;  %v436_v43 = vpop.f32.mrf.mxu2  ;;  %v450_v45 = vpop.f32.mrf.mxu3 }
 0x1be   :  { %v437_v44 = vadd.f32 %v436_v43, %v226_v40  ;;  %v410_v46 = vpop.f32.mrf.mxu0  ;;  %v424_v50 = vpop.f32.mrf.mxu1  ;;  %v1224_v43 = vld [vmem:[#allocation12 + $0x54] sm:$0xf0] }
 0x1bf   :  { %v1512_v47 = vmin.f32 %v463_v42, 16.0  ;;  %v411_v48 = vadd.f32 %v410_v46, %v225_v35 }
 0x1c0   :  { %v1514_v49 = vadd.f32 %v450_v45, %v437_v44 }
 0x1c1   :  { %v465_v51 = vmul.f32 2.1237322e-06, %v1512_v47  ;;  %v476_v52 = vmul.f32 3.8918573e-05, %v1512_v47  ;;  %v1518_v53 = vadd.f32 %v424_v50, %v411_v48  ;;  %v1094_v48 = vor.u32 %v1224_v43, %v1093_v36  ;;  %v1223_v50 = vld [vmem:[#allocation12 + $0x54] sm:$0xf] }
 0x1c2   :  { %v1521_v55 = vmul.f32 0.70710677, %v1514_v49  ;;  %v1098_v59 = vor.u32 %v1223_v50, %v1095_v56  ;;  %v1220_v56 = vld [vmem:[#allocation12 + $0x34] sm:$0xf0] }
 0x1c3   :  { %v466_v57 = vadd.f32 0.00028619796, %v465_v51  ;;  %v477_v58 = vadd.f32 0.001143296, %v476_v52  ;;  %v1526_v61 = vmul.f32 0.70710677, %v1518_v53  ;;  %832 = vmatpush.bf16.msrb.mxu0 %v1094_v48 }
 0x1c4   :  { %v503_v60 = vmul.f32 %v1521_v55, %v1521_v55  ;;  %860 = vmatpush.bf16.msrb.mxu2 %v1098_v59 }
 0x1c5   :  { %v467_v0 = vmul.f32 %v466_v57, %v1512_v47  ;;  %v478_v1 = vmul.f32 %v477_v58, %v1512_v47  ;;  %v438_v2 = vpop.f32.mrf.mxu2  ;;  %v543_v8 = vmul.f32 %v1526_v61, %v1526_v61  ;;  %v452_v18 = vpop.f32.mrf.mxu3 }
 0x1c6   :  { %v1530_v7 = vmin.f32 %v503_v60, 16.0  ;;  %v439_v9 = vadd.f32 %v438_v2, %v226_v40  ;;  %v1165_v60 = vld [vmem:[#allocation12 + $0xe0] sm:$0xf] }
 0x1c7   :  { %v468_v13 = vadd.f32 0.0036580483, %v467_v0  ;;  %v479_v14 = vadd.f32 0.014752088, %v478_v1  ;;  %v1536_v21 = vmin.f32 %v543_v8, 16.0  ;;  %v1166_v5 = vor.u32 %v1242_v62, %v1165_v60 }
 0x1c8   :  { %v505_v19 = vmul.f32 2.1237322e-06, %v1530_v7  ;;  %v516_v20 = vmul.f32 3.8918573e-05, %v1530_v7  ;;  %v1540_v24 = vadd.f32 %v452_v18, %v439_v9  ;;  %v1085_v18 = vld [vmem:[#allocation12 + $0x40] sm:$0xf] }
 0x1c9   :  { %v469_v22 = vmul.f32 %v468_v13, %v1512_v47  ;;  %v480_v23 = vmul.f32 %v479_v14, %v1512_v47  ;;  %v545_v29 = vmul.f32 2.1237322e-06, %v1536_v21  ;;  %v556_v33 = vmul.f32 3.8918573e-05, %v1536_v21  ;;  %845 = vmatpush.bf16.msrb.mxu1 %v1166_v5  ;;  %v1241_v13 = vld [vmem:[#allocation12 + $0xe4] sm:$0xf] }
 0x1ca   :  { %v506_v27 = vadd.f32 0.00028619796, %v505_v19  ;;  %v517_v28 = vadd.f32 0.001143296, %v516_v20  ;;  %v1548_v42 = vmul.f32 0.70710677, %v1540_v24 }
 0x1cb   :  { %v470_v31 = vadd.f32 0.05243302, %v469_v22  ;;  %v481_v32 = vadd.f32 0.112945676, %v480_v23  ;;  %v546_v35 = vadd.f32 0.00028619796, %v545_v29 }
 0x1cc   :  { %v518_v16 = vmul.f32 %v517_v28, %v1530_v7  ;;  %v507_v38 = vmul.f32 %v506_v27, %v1530_v7  ;;  %v557_v40 = vadd.f32 0.001143296, %v556_v33  ;;  %v583_v54 = vmul.f32 %v1548_v42, %v1548_v42  ;;  %v1167_v14 = vld [vmem:[#allocation12 + $0xe8] sm:$0xf0]  ;;  %v1222_v22 = vld [vmem:[#allocation12 + $0x44] sm:$0xf0] }
 0x1cd   :  { %v482_v37 = vmul.f32 %v481_v32, %v1512_v47  ;;  %v471_v44 = vmul.f32 %v470_v31, %v1512_v47  ;;  %v547_v46 = vmul.f32 %v546_v35, %v1536_v21  ;;  %v1170_v26 = vor.u32 %v1241_v13, %v1167_v14  ;;  %v1087_v29 = vld [vmem:[#allocation12 + $0x48] sm:$0xf0]  ;;  %v1157_v33 = vld [vmem:[#allocation12 + $0xd0] sm:$0xf] }
 0x1ce   :  { %v519_v45 = vadd.f32 0.014752088, %v518_v16  ;;  %v558_v52 = vmul.f32 %v557_v40, %v1536_v21  ;;  %v1557_v1 = vmin.f32 %v583_v54, 16.0  ;;  %v508_v3 = vadd.f32 0.0036580483, %v507_v38 }
 0x1cf   :  { %v483_v51 = vadd.f32 0.4994258, %v482_v37  ;;  %v548_v58 = vadd.f32 0.0036580483, %v547_v46  ;;  %v472_v2 = vadd.f32 0.18741608, %v471_v44  ;;  %873 = vmatpush.bf16.msrb.mxu3 %v1170_v26  ;;  %v1090_v37 = vor.u32 %v1221_v11, %v1087_v29 }
 0x1d0   :  { %v520_v57 = vmul.f32 %v519_v45, %v1530_v7  ;;  %v559_v0 = vadd.f32 0.014752088, %v558_v52  ;;  %v585_v9 = vmul.f32 2.1237322e-06, %v1557_v1  ;;  %v596_v15 = vmul.f32 3.8918573e-05, %v1557_v1 }
 0x1d1   :  { %v484_v63 = vmul.f32 %v483_v51, %v1512_v47  ;;  %v549_v12 = vmul.f32 %v548_v58, %v1536_v21  ;;  %v473_v17 = vmul.f32 %v472_v2, %v1512_v47  ;;  %v509_v19 = vmul.f32 %v508_v3, %v1530_v7  ;;  %861 = vmatpush.bf16.msrb.mxu2 %v1090_v37  ;;  %v1239_v51 = vld [vmem:[#allocation12 + $0xd4] sm:$0xf]  ;;  %v1159_v52 = vld [vmem:[#allocation12 + $0xd8] sm:$0xf0]  ;;  %v1077_v54 = vld [vmem:[#allocation12 + $0x30] sm:$0xf] }
 0x1d2   :  { %v521_v4 = vadd.f32 0.112945676, %v520_v57  ;;  %v560_v8 = vmul.f32 %v559_v0, %v1536_v21  ;;  %v586_v25 = vadd.f32 0.00028619796, %v585_v9  ;;  %v597_v32 = vadd.f32 0.001143296, %v596_v15 }
 0x1d3   :  { %v1559_v6 = vadd.f32 1.0, %v484_v63  ;;  %v550_v28 = vadd.f32 0.05243302, %v549_v12  ;;  %v1086_v47 = vor.u32 %v1222_v22, %v1085_v18  ;;  %v1572_v16 = vadd.f32 1.1283791, %v473_v17 }
 0x1d4   :  { %v522_v10 = vmul.f32 %v521_v4, %v1530_v7  ;;  %v561_v23 = vadd.f32 0.112945676, %v560_v8  ;;  %v587_v31 = vmul.f32 %v586_v25, %v1557_v1  ;;  %v510_v35 = vadd.f32 0.05243302, %v509_v19  ;;  %v1219_v57 = vld [vmem:[#allocation12 + $0x34] sm:$0xf] }
 0x1d5   :  { %1259 = vrcp.f32 %v1559_v6  ;;  %v495_v40 = vand.u32 2147483647, %v1559_v6  ;;  %v598_v44 = vmul.f32 %v597_v32, %v1557_v1  ;;  %833 = vmatpush.bf16.msrb.mxu0 %v1086_v47  ;;  %v1158_v45 = vor.u32 %v1240_v34, %v1157_v33  ;;  %v1079_v63 = vld [vmem:[#allocation12 + $0x38] sm:$0xf0]  ;;  %v1149_v3 = vld [vmem:[#allocation12 + $0xc0] sm:$0xf] }
 0x1d6   :  { %v523_v20 = vadd.f32 0.4994258, %v522_v10  ;;  %v562_v30 = vmul.f32 %v561_v23, %v1536_v21  ;;  %v551_v48 = vmul.f32 %v550_v28, %v1536_v21  ;;  %v588_v50 = vadd.f32 0.0036580483, %v587_v31  ;;  %v1238_v4 = vld [vmem:[#allocation12 + $0xc4] sm:$0xf0] }
 0x1d7   :  { %846 = vmatpush.bf16.msrb.mxu1 %v1158_v45  ;;  %v511_v59 = vmul.f32 %v510_v35, %v1530_v7  ;;  %v599_v62 = vadd.f32 0.014752088, %v598_v44  ;;  %v497_v0 = vand.u32 2147483648, %v1559_v6  ;;  %v1162_v2 = vor.u32 %v1239_v51, %v1159_v52  ;;  %v1237_v17 = vld [vmem:[#allocation12 + $0xc4] sm:$0xf] }
 0x1d8   :  { %v524_v27 = vmul.f32 %v523_v20, %v1530_v7  ;;  %v563_v43 = vadd.f32 0.4994258, %v562_v30  ;;  %v552_v8 = vadd.f32 0.18741608, %v551_v48  ;;  %v589_v12 = vmul.f32 %v588_v50, %v1557_v1  ;;  %v1151_v19 = vld [vmem:[#allocation12 + $0xc8] sm:$0xf0] }
 0x1d9   :  { %v600_v10 = vmul.f32 %v599_v62, %v1557_v1  ;;  %874 = vmatpush.bf16.msrb.mxu3 %v1162_v2  ;;  %v1078_v13 = vor.u32 %v1220_v56, %v1077_v54  ;;  %v1082_v14 = vor.u32 %v1219_v57, %v1079_v63  ;;  %v1150_v15 = vor.u32 %v1238_v4, %v1149_v3  ;;  %v1069_v23 = vld [vmem:[#allocation12 + $0x20] sm:$0xf]  ;;  %v1218_v25 = vld [vmem:[#allocation12 + $0x24] sm:$0xf0]  ;;  %v1217_v11 = vld [vmem:[#allocation12 + $0x24] sm:$0xf] }
 0x1da   :  { %v1574_v36 = vadd.f32 1.0, %v524_v27  ;;  %v564_v60 = vmul.f32 %v563_v43, %v1536_v21  ;;  %v512_v22 = vadd.f32 0.18741608, %v511_v59  ;;  %v1071_v27 = vld [vmem:[#allocation12 + $0x28] sm:$0xf0]  ;;  %vm491_vm8 = vweird.f32 %v1559_v6 }
 0x1db   :  { %v1576_v38 = vpop.eup %1259  ;;  %834 = vmatpush.bf16.msrb.mxu0 %v1078_v13  ;;  %862 = vmatpush.bf16.msrb.mxu2 %v1082_v14  ;;  %v1141_v28 = vld [vmem:[#allocation12 + $0xb0] sm:$0xf]  ;;  %v601_v29 = vadd.f32 0.112945676, %v600_v10  ;;  %v1154_v30 = vor.u32 %v1237_v17, %v1151_v19  ;;  %v1236_v31 = vld [vmem:[#allocation12 + $0xb4] sm:$0xf0]  ;;  %v553_v35 = vmul.f32 %v552_v8, %v1536_v21  ;;  %v1074_v48 = vor.u32 %v1217_v11, %v1071_v27 }
 0x1dc   :  { %v487_v46 = vmul.f32 %v1576_v38, %v1559_v6  ;;  %1261 = vrcp.f32 %v1574_v36  ;;  %v1588_v9 = vadd.f32 1.0, %v564_v60  ;;  %vm492_vm7 = vweird.f32 %v1576_v38  ;;  %847 = vmatpush.bf16.msrb.mxu1 %v1150_v15  ;;  %v1235_v32 = vld [vmem:[#allocation12 + $0xb4] sm:$0xf]  ;;  %v1143_v43 = vld [vmem:[#allocation12 + $0xb8] sm:$0xf0] }
 0x1dd   :  { %vm1602_vm9 = vmor %vm491_vm8, %vm492_vm7  ;;  %v498_v33 = vor.u32 1.1754944e-38, %v497_v0  ;;  %v590_v37 = vadd.f32 0.05243302, %v589_v12  ;;  %v602_v45 = vmul.f32 %v601_v29, %v1557_v1  ;;  %875 = vmatpush.bf16.msrb.mxu3 %v1154_v30  ;;  %v1061_v50 = vld [vmem:[#allocation12 + $0x10] sm:$0xf]  ;;  %v1142_v54 = vor.u32 %v1236_v31, %v1141_v28 }
 0x1de   :  { %v488_v58 = vsub.f32 1.0, %v487_v46  ;;  %1263 = vrcp.f32 %v1588_v9  ;;  %v1070_v46 = vor.u32 %v1218_v25, %v1069_v23  ;;  %v1216_v51 = vld [vmem:[#allocation12 + $0x14] sm:$0xf0]  ;;  %v1215_v52 = vld [vmem:[#allocation12 + $0x14] sm:$0xf]  ;;  %v1146_v56 = vor.u32 %v1235_v32, %v1143_v43 }
 0x1df   :  { %v1063_v57 = vld [vmem:[#allocation12 + $0x18] sm:$0xf0]  ;;  %v1234_v59 = vld [vmem:[#allocation12 + $0xa4] sm:$0xf0]  ;;  %vm496_vm10 = vcmp.eq.f32.partialorder %v495_v40, 8.507059e+37  ;;  %863 = vmatpush.bf16.msrb.mxu2 %v1074_v48  ;;  %v475_v0 = vmul.f32 %v1572_v16, %v1508_v41  ;;  %v513_v15 = vmul.f32 %v512_v22, %v1530_v7  ;;  %v577_v16 = vand.u32 2147483648, %v1588_v9 }
 0x1e0   :  { %v489_v5 = vmul.f32 %v1576_v38, %v488_v58  ;;  %v1133_v58 = vld [vmem:[#allocation12 + $0xa0] sm:$0xf]  ;;  %v603_v60 = vadd.f32 0.4994258, %v602_v45  ;;  %835 = vmatpush.bf16.msrb.mxu0 %v1070_v46  ;;  %v1066_v62 = vor.u32 %v1215_v52, %v1063_v57  ;;  %v1233_v63 = vld [vmem:[#allocation12 + $0xa4] sm:$0xf]  ;;  %848 = vmatpush.bf16.msrb.mxu1 %v1142_v54  ;;  %v591_v17 = vmul.f32 %v590_v37, %v1557_v1 }
 0x1e1   :  { %v554_v3 = vadd.f32 1.1283791, %v553_v35  ;;  %v1053_v8 = vld [vmem:[#allocation12] sm:$0xf]  ;;  %876 = vmatpush.bf16.msrb.mxu3 %v1146_v56  ;;  %v1134_v10 = vor.u32 %v1234_v59, %v1133_v58  ;;  %v1214_v13 = vld [vmem:[#allocation12 + $0x4] sm:$0xf0]  ;;  %vm531_vm12 = vweird.f32 %v1574_v36  ;;  %vm571_vm14 = vweird.f32 %v1588_v9 }
 0x1e2   :  { %v1592_v20 = vpop.eup %1261  ;;  %v490_v18 = vadd.f32 %v1576_v38, %v489_v5  ;;  %v1135_v5 = vld [vmem:[#allocation12 + $0xa8] sm:$0xf0]  ;;  %v604_v40 = vmul.f32 %v603_v60, %v1557_v1  ;;  %v1213_v14 = vld [vmem:[#allocation12 + $0x4] sm:$0xf]  ;;  %v1232_v27 = vld [vmem:[#allocation12 + $0x94] sm:$0xf0] }
 0x1e3   :  { %v527_v26 = vmul.f32 %v1592_v20, %v1574_v36  ;;  %v1138_v12 = vor.u32 %v1233_v63, %v1135_v5  ;;  %v1055_v19 = vld [vmem:[#allocation12 + $0x8] sm:$0xf0]  ;;  %864 = vmatpush.bf16.msrb.mxu2 %v1066_v62  ;;  %v1231_v28 = vld [vmem:[#allocation12 + $0x94] sm:$0xf]  ;;  %v575_v7 = vand.u32 2147483647, %v1588_v9  ;;  %vm532_vm13 = vweird.f32 %v1592_v20 }
 0x1e4   :  { %v494_v44 = vsel %vm1602_vm9, %v1576_v38, %v490_v18  ;;  %v1611_v21 = vpop.eup %1263  ;;  %v1062_v38 = vor.u32 %v1216_v51, %v1061_v50  ;;  %v1125_v18 = vld [vmem:[#allocation12 + $0x90] sm:$0xf]  ;;  %v1624_v25 = vadd.f32 1.0, %v604_v40  ;;  %v1058_v11 = vor.u32 %v1213_v14, %v1055_v19  ;;  %849 = vmatpush.bf16.msrb.mxu1 %v1134_v10  ;;  %v1127_v30 = vld [vmem:[#allocation12 + $0x98] sm:$0xf0]  ;;  %vm1643_vm0 = vmor %vm531_vm12, %vm532_vm13 }
 0x1e5   :  { %v528_v34 = vsub.f32 1.0, %v527_v26  ;;  %v499_v2 = vsel %vm496_vm10, %v498_v33, %v494_v44  ;;  %v567_v4 = vmul.f32 %v1611_v21, %v1588_v9  ;;  %v1054_v26 = vor.u32 %v1214_v13, %v1053_v8  ;;  %877 = vmatpush.bf16.msrb.mxu3 %v1138_v12  ;;  %v1117_v32 = vld [vmem:[#allocation12 + $0x80] sm:$0xf]  ;;  %v1230_v47 = vld [vmem:[#allocation12 + $0x84] sm:$0xf0] }
 0x1e6   :  { %v500_v23 = vmul.f32 %v499_v2, %v475_v0  ;;  %836 = vmatpush.bf16.msrb.mxu0 %v1062_v38  ;;  %vm572_vm11 = vweird.f32 %v1611_v21  ;;  %v1126_v22 = vor.u32 %v1232_v27, %v1125_v18  ;;  %1265 = vrcp.f32 %v1624_v25  ;;  %v1229_v37 = vld [vmem:[#allocation12 + $0x84] sm:$0xf]  ;;  %v1119_v43 = vld [vmem:[#allocation12 + $0x88] sm:$0xf0] }
 0x1e7   :  { %v529_v6 = vmul.f32 %v1592_v20, %v528_v34  ;;  %v568_v41 = vsub.f32 1.0, %v567_v4  ;;  %v537_v33 = vand.u32 2147483648, %v1574_v36  ;;  %v1130_v35 = vor.u32 %v1231_v28, %v1127_v30  ;;  %vm573_vm15 = vmor %vm571_vm14, %vm572_vm11  ;;  %865 = vmatpush.bf16.msrb.mxu2 %v1058_v11 }
 0x1e8   :  { %v1047_v44 = vclamps-f32 %v500_v23, 1.0  ;;  %v535_v45 = vand.u32 2147483647, %v1574_v36  ;;  %v578_v46 = vor.u32 1.1754944e-38, %v577_v16  ;;  %v592_v48 = vadd.f32 0.18741608, %v591_v17  ;;  %850 = vmatpush.bf16.msrb.mxu1 %v1126_v22 }
 0x1e9   :  { %v569_v29 = vmul.f32 %v1611_v21, %v568_v41  ;;  %v530_v31 = vadd.f32 %v1592_v20, %v529_v6  ;;  %v555_v9 = vmul.f32 %v554_v3, %v1526_v61  ;;  %vm576_vm1 = vcmp.eq.f32.partialorder %v575_v7, 8.507059e+37  ;;  %878 = vmatpush.bf16.msrb.mxu3 %v1130_v35 }
 0x1ea   :  { %837 = vmatpush.bf16.msrb.mxu0 %v1054_v26  ;;  %v1118_v52 = vor.u32 %v1230_v47, %v1117_v32  ;;  %v514_v54 = vadd.f32 1.1283791, %v513_v15  ;;  %v1122_v58 = vor.u32 %v1229_v37, %v1119_v43  ;;  %v538_v36 = vor.u32 1.1754944e-38, %v537_v33 }
 0x1eb   :  { %v570_v34 = vadd.f32 %v1611_v21, %v569_v29  ;;  %v534_v56 = vsel %vm1643_vm0, %v1592_v20, %v530_v31  ;;  %v623_v38 = vadd.f32 1.0, %v1047_v44  ;;  %vm536_vm2 = vcmp.eq.f32.partialorder %v535_v45, 8.507059e+37 }
 0x1ec   :  { %v1266_v60 = vpop.eup %1265  ;;  %v593_v61 = vmul.f32 %v592_v48, %v1557_v1  ;;  %v539_v62 = vsel %vm536_vm2, %v538_v36, %v534_v56  ;;  %851 = vmatpush.bf16.msrb.mxu1 %v1118_v52  ;;  %v455_v0 = vmul.f32 0.5, %v1505_v39  ;;  %v515_v2 = vmul.f32 %v514_v54, %v1521_v55 }
 0x1ed   :  { %v574_v51 = vsel %vm573_vm15, %v1611_v21, %v570_v34  ;;  %v607_v63 = vmul.f32 %v1266_v60, %v1624_v25  ;;  %879 = vmatpush.bf16.msrb.mxu3 %v1122_v58  ;;  %v457_v20 = vmul.f32 0.5, %v1518_v53  ;;  %v617_v40 = vand.u32 2147483648, %v1624_v25 }
 0x1ee   :  { %v579_v57 = vsel %vm576_vm1, %v578_v46, %v574_v51  ;;  %v627_v5 = vmul.f32 %v623_v38, %v455_v0  ;;  %v540_v8 = vmul.f32 %v539_v62, %v515_v2  ;;  %v594_v6 = vadd.f32 1.1283791, %v593_v61 }
 0x1ef   :  { %v580_v59 = vmul.f32 %v579_v57, %v555_v9  ;;  %v608_v4 = vsub.f32 1.0, %v607_v63  ;;  %vm612_vm3 = vweird.f32 %v1266_v60  ;;  %v615_v12 = vand.u32 2147483647, %v1624_v25 }
 0x1f0   :  { %vm611_vm4 = vweird.f32 %v1624_v25  ;;  %v618_v55 = vor.u32 1.1754944e-38, %v617_v40  ;;  %v1048_v14 = vclamps-f32 %v540_v8, 1.0  ;;  %v595_v53 = vmul.f32 %v594_v6, %v1548_v42  ;;  %v188_v42 = vld [vmem:[%s1678_s6] sm:$0x3]  ;;  %s894_s6 = sshll.u32 %s1428_s28, 4  ;;  %s895_s6 = int_to_ptr.vmem [resolvable:$true] %s894_s6 }
 0x1f1   :  { %v1049_v21 = vclamps-f32 %v580_v59, 1.0  ;;  %v609_v10 = vmul.f32 %v1266_v60, %v608_v4  ;;  %vm613_vm5 = vmor %vm611_vm4, %vm612_vm3  ;;  %vm616_vm6 = vcmp.eq.f32.partialorder %v615_v12, 8.507059e+37  ;;  %v456_v18 = vmul.f32 0.5, %v1514_v49 }
 0x1f2   :  { %v624_v17 = vadd.f32 1.0, %v1048_v14  ;;  %v458_v23 = vmul.f32 0.5, %v1540_v24  ;;  %v666_v29 = vperm.slane %v188_v42, 0  ;;  %v667_v32 = vperm.slane %v188_v42, 1 }
 0x1f3   :  { %v625_v3 = vadd.f32 1.0, %v1049_v21  ;;  %v610_v13 = vadd.f32 %v1266_v60, %v609_v10 }
 0x1f4   :  { %v628_v25 = vmul.f32 %v624_v17, %v456_v18 }
 0x1f5   :  { %v629_v1 = vmul.f32 %v625_v3, %v457_v20  ;;  %v614_v15 = vsel %vm613_vm5, %v1266_v60, %v610_v13 }
 0x1f6   :  { %v619_v41 = vsel %vm616_vm6, %v618_v55, %v614_v15 }
 0x1f7   :  { %v631_v39 = vpack.c.bf16 %v629_v1, %v627_v5  ;;  %v620_v16 = vmul.f32 %v619_v41, %v595_v53 }
 0x1f9   :  { %838 = vmatmul.bf16.vlgmr.msrb.gmra.mxu0 %v631_v39  ;;  %866 = vmatmul.bf16.vlgmr.msrb.gmra.mxu2 %v631_v39  ;;  %v1050_v19 = vclamps-f32 %v620_v16, 1.0 }
 0x1fb   :  { %v626_v26 = vadd.f32 1.0, %v1050_v19 }
 0x1fd   :  { %v630_v11 = vmul.f32 %v626_v26, %v458_v23 }
 0x1ff   :  { %v632_v27 = vpack.c.bf16 %v630_v11, %v628_v25 }
 0x201   :  { %852 = vmatmul.bf16.vlgmr.msrb.gmra.mxu1 %v632_v27  ;;  %880 = vmatmul.bf16.vlgmr.msrb.gmra.mxu3 %v632_v27 }
 0x276   :  { %v839_v28 = vpop.f32.mrf.mxu0 }
 0x277   :  { %v840_v7 = vadd.f32 %v839_v28, %v666_v29 }
 0x27c   :  { %v867_v30 = vpop.f32.mrf.mxu2 }
 0x27d   :  { %v868_v24 = vadd.f32 %v867_v30, %v667_v32 }
 0x27e   :  { %v853_v22 = vpop.f32.mrf.mxu1  ;;  %v841_v49 = vpop.f32.mrf.mxu0 }
 0x27f   :  { %v854_v31 = vadd.f32 %v853_v22, %v840_v7  ;;  %v842_v33 = vadd.f32 %v841_v49, %v666_v29 }
 0x281   :  { %886 = vst [vmem:[#allocation13] sm:$0xff] %v854_v31 }
 0x284   :  { %v881_v47 = vpop.f32.mrf.mxu3  ;;  %v869_v43 = vpop.f32.mrf.mxu2 }
 0x285   :  { %v882_v34 = vadd.f32 %v881_v47, %v868_v24  ;;  %v870_v44 = vadd.f32 %v869_v43, %v667_v32 }
 0x286   :  { %v855_v35 = vpop.f32.mrf.mxu1 }
 0x287   :  { %887 = vst [vmem:[#allocation13 + $0x8] sm:$0xff] %v882_v34  ;;  %v856_v37 = vadd.f32 %v855_v35, %v842_v33 }
 0x289   :  { %888 = vst [vmem:[#allocation13 + $0x10] sm:$0xff] %v856_v37 }
 0x28c   :  { %v883_v45 = vpop.f32.mrf.mxu3 }
 0x28d   :  { %v884_v46 = vadd.f32 %v883_v45, %v870_v44 }
 0x28f   :  { %889 = vst [vmem:[#allocation13 + $0x18] sm:$0xff] %v884_v46 }
 0x290   :  { %902 = dma.vmem_to_hbm [thread:$0]  %s895_s6, 512, %s897_s8, [#allocation6], %s1424_s19, %s1424_s19, %s1425_s20  }
 0x291   :  { %1417 = dma.done.wait [#allocation6], 512  }
 0x292   :  { %1418 = vsyncadd [#allocation6], 4294966784 }
 0x293   :  { %907 = vsyncpa [#allocation5], 1 }
 0x294   :  { %908 = vsyncpa [#allocation8], 1 }
 0x295   :  { %909 = vsyncpa [#allocation11], 1 }
 0x296   :  { %910 = vsyncpa [#allocation6], 1 }

</bundles_post_ra>
